<compile_context>
chip_gen: v6e
topology: v6e:2x2x1
jax: 0.10.0
libtpu: 0.0.40
codegen_flags: <defaults>
</compile_context>

<pallas_src>
import functools

import jax
import jax.numpy as jnp
from jax.experimental import pallas as pl
from jax.experimental.pallas import tpu as pltpu

NUM_OPS = 4              # size of the `operations` list given to SubPolicyStage
RELAX_TEMPERATURE = 0.1  # RelaxedOneHotCategorical temperature used in forward

LANES = 512              # lane-dense minor dim (multiple of 128)
ROW_BLOCK = 1024         # 1024 * 512 * 4B = 2 MiB per buffer


# ----------------------------------------------------------------------------
# Candidate augmentation operations (elementwise, affine; `y` is ignored,
# matching typical image-aug ops that do not use the labels).
# ----------------------------------------------------------------------------
def _op_outputs(x):
    return (
        x,                       # op 0: identity
        x + 0.1,                 # op 1: brightness shift
        1.0 - x,                 # op 2: invert
        1.5 * (x - 0.5) + 0.5,   # op 3: contrast
    )


# affine form of each op above: op_i(x) = _OP_A[i] * x + _OP_B[i]
_OP_A = jnp.array([1.0, 1.0, -1.0, 1.5], jnp.float32)
_OP_B = jnp.array([0.0, 0.1, 1.0, -0.25], jnp.float32)


def _fold_stages_to_affine(stage_weights):
    """Fold all SubPolicyStage's into one composed affine map x -> A*x + B."""
    A = jnp.float32(1.0)
    B = jnp.float32(0.0)
    for s in range(stage_weights.shape[0]):          # operation_count is small/static
        w = stage_weights[s]
        a_s = jnp.dot(w, _OP_A)                       # sum_i w_i * slope_i
        b_s = jnp.dot(w, _OP_B)                       # sum_i w_i * intercept_i
        A = a_s * A                                   # compose: stage after stage
        B = a_s * B + b_s
    return jnp.stack([A, B])                          # (2,) float32


# ----------------------------------------------------------------------------
# Pallas kernel: the entire fused policy is one affine update per element.
# ----------------------------------------------------------------------------
def _affine_kernel(ab_ref, x_ref, o_ref):
    # ab_ref : SMEM (2,) float32  -> composed [A, B]
    # x_ref  : VMEM (block_rows, LANES) float32 input tile
    # o_ref  : VMEM (block_rows, LANES) float32 output tile (aliases input slab)
    a = ab_ref[0]
    b = ab_ref[1]
    o_ref[...] = a * x_ref[...] + b


@functools.partial(jax.jit, donate_argnums=(0,))
def _policy_forward(x, ab):
    """Apply the fused (composed-affine) policy to x with one pallas_call."""
    orig_shape = x.shape
    flat = x.reshape(-1)
    total = flat.shape[0]

    rows = pl.cdiv(total, LANES)
    pad = rows * LANES - total
    if pad:  # slow path only when total % LANES != 0 (not the common NCHW case)
        flat = jnp.pad(flat, (0, pad))
    x2d = flat.reshape(rows, LANES)

    if rows <= 8:
        block_rows = rows                       # full extent -> legal single block
    else:
        # >=2 grid steps (v7x megacore), rows multiple of 8, capped at ROW_BLOCK.
        half = -(-rows // 2)
        block_rows = min(ROW_BLOCK, -(-half // 8) * 8)
    grid = (pl.cdiv(rows, block_rows),)         # ragged last block is clipped

    out = pl.pallas_call(
        _affine_kernel,
        out_shape=jax.ShapeDtypeStruct((rows, LANES), x2d.dtype),
        grid=grid,
        in_specs=[
            pl.BlockSpec(memory_space=pltpu.MemorySpace.SMEM),    # [A, B]
            pl.BlockSpec((block_rows, LANES), lambda i: (i, 0)),  # x tile
        ],
        out_specs=pl.BlockSpec((block_rows, LANES), lambda i: (i, 0)),
        input_output_aliases={1: 0},            # reuse x's (donated) HBM slab
        cost_estimate=pl.CostEstimate(
            flops=2 * rows * LANES,
            transcendentals=0,
            bytes_accessed=2 * rows * LANES * 4,
        ),
        compiler_params=pltpu.CompilerParams(
            dimension_semantics=("parallel",),
            vmem_limit_bytes=32 * 1024 * 1024,
        ),
    )(ab, x2d)

    if pad:
        out = out.reshape(-1)[:total]
    return out.reshape(orig_shape)


# ----------------------------------------------------------------------------
# Sampling glue (training-mode RelaxedOneHotCategorical + straight-through,
# eval-mode Categorical), mirroring SubPolicyStage.forward.
# ----------------------------------------------------------------------------
def _sample_op_weights(logits, key, training=True):
    if training:
        g = jax.random.gumbel(key, (NUM_OPS,), dtype=jnp.float32)
        wt = jax.nn.softmax((logits + g) / RELAX_TEMPERATURE)
        idx = jnp.argmax(wt)
        mag = wt[idx] / jax.lax.stop_gradient(wt[idx])   # value 1.0, ST gradient
        return jnp.zeros((NUM_OPS,), jnp.float32).at[idx].set(mag)
    else:
        idx = jax.random.categorical(key, logits)
        return jax.nn.one_hot(idx, NUM_OPS, dtype=jnp.float32)


# ----------------------------------------------------------------------------
# Policy (num_sub_policies=1, operation_count=2, num_chunks=1)
# ----------------------------------------------------------------------------
class PallasPolicy:
    def __init__(self, num_sub_policies=1, operation_count=2, num_chunks=1):
        self.num_sub_policies = num_sub_policies
        self.operation_count = operation_count
        self.num_chunks = num_chunks
        # SubPolicyStage._weights = nn.Parameter(torch.ones(len(operations)))
        self.stage_logits = [
            jnp.ones((operation_count, NUM_OPS), jnp.float32)
            for _ in range(num_sub_policies)
        ]

    def _sample_all_weights(self, key, training):
        logits = self.stage_logits[0]            # Policy._forward: index = 0
        keys = jax.random.split(key, self.operation_count)
        return jnp.stack([
            _sample_op_weights(logits[s], keys[s], training)
            for s in range(self.operation_count)
        ])                                       # (operation_count, NUM_OPS)

    def __call__(self, x, y, key, training=True):
        assert x.dtype == jnp.float32, "kernel assumes float32 images"
        ws = self._sample_all_weights(key, training)
        ab = _fold_stages_to_affine(ws)
        return _policy_forward(x, ab)            # donates x's buffer

    # pure-JAX reference (torch.stack([w_i * op_i(x)]).sum(0) per stage)
    def reference(self, x, y, key, training=True):
        ws = self._sample_all_weights(key, training)
        for s in range(self.operation_count):
            outs = jnp.stack(_op_outputs(x))     # (NUM_OPS, N, C, H, W)
            x = (ws[s][:, None, None, None, None] * outs).sum(0)
        return x


if __name__ == "__main__":
    key = jax.random.PRNGKey(0)
    kx, ky, kpolicy = jax.random.split(key, 3)

    # Small NCHW image batch + labels (y accepted but unused by the ops).
    x = jax.random.uniform(kx, (2, 4, 16, 16), dtype=jnp.float32)
    y = jax.random.randint(ky, (2,), 0, 10)

    policy = PallasPolicy(num_sub_policies=1, operation_count=2, num_chunks=1)

    expected_shape, expected_dtype = x.shape, x.dtype
    # Compute the pure-JAX reference BEFORE the kernel call (which donates x).
    ref = policy.reference(x, y, kpolicy, training=True)

    out = policy(x, y, kpolicy, training=True)
    out = jax.block_until_ready(out)

    assert out.shape == expected_shape and out.dtype == expected_dtype
    assert jnp.allclose(out, ref, atol=1e-5, rtol=1e-5)

    print("KERNEL_OK")
</pallas_src>

<mosaic_0001>
module attributes {stable_mosaic.version = 11 : i64} {
  func.func @_affine_kernel(%arg0: i32, %arg1: memref<2xf32, #tpu.memory_space<smem>>, %arg2: memref<4x512xf32, #tpu.memory_space<vmem>>, %arg3: memref<4x512xf32, #tpu.memory_space<vmem>>) attributes {dimension_semantics = [#tpu.dimension_semantics<parallel>], iteration_bounds = array<i64: 1>, scalar_prefetch = 0 : i64, scratch_operands = 0 : i64, tpu.core_type = #tpu.core_type<tc>, window_params = [{transform_indices = @transform_0, window_bounds = array<i64: 2>}, {transform_indices = @transform_1, window_bounds = array<i64: 4, 512>}, {transform_indices = @transform_2, window_bounds = array<i64: 4, 512>}]} {
    %c0 = arith.constant 0 : index
    %0 = memref.load %arg1[%c0] : memref<2xf32, #tpu.memory_space<smem>>
    %c1 = arith.constant 1 : index
    %1 = memref.load %arg1[%c1] : memref<2xf32, #tpu.memory_space<smem>>
    %c0_0 = arith.constant 0 : index
    %c0_1 = arith.constant 0 : index
    %2 = vector.load %arg2[%c0_0, %c0_1] : memref<4x512xf32, #tpu.memory_space<vmem>>, vector<4x512xf32>
    %3 = vector.broadcast %0 : f32 to vector<4x512xf32>
    %4 = arith.mulf %3, %2 : vector<4x512xf32>
    %5 = vector.broadcast %1 : f32 to vector<4x512xf32>
    %6 = arith.addf %4, %5 : vector<4x512xf32>
    %c0_2 = arith.constant 0 : index
    %c0_3 = arith.constant 0 : index
    %7 = vector.load %arg3[%c0_2, %c0_3] : memref<4x512xf32, #tpu.memory_space<vmem>>, vector<4x512xf32>
    tpu.vector_store %arg3[%c0_2, %c0_3], %6 {strides = array<i32>} : memref<4x512xf32, #tpu.memory_space<vmem>>, vector<4x512xf32>,
    return
  }
  func.func @transform_0(%arg0: i32) -> i32 {
    %c0_i32 = arith.constant 0 : i32
    %c0_i32_0 = arith.constant 0 : i32
    return %c0_i32 : i32
  }
  func.func @transform_1(%arg0: i32) -> (i32, i32) {
    %c0_i32 = arith.constant 0 : i32
    %c0_i32_0 = arith.constant 0 : i32
    return %arg0, %c0_i32 : i32, i32
  }
  func.func @transform_2(%arg0: i32) -> (i32, i32) {
    %c0_i32 = arith.constant 0 : i32
    %c0_i32_0 = arith.constant 0 : i32
    return %arg0, %c0_i32 : i32, i32
  }
}

</mosaic_0001>

<bundles_post_ra>
// kernel: _policy_forward.1
= control target key start
LH: loop header
LB: loop body
LE: loop exit
PB: predicated region body
PF: predicated region fallthrough
CT: control target
= control target key end

     0   :  { %7 = vsyncpa [#allocation3], 0  ;;  %s88_s0 = inlined_call_operand.vmem [shape: f32[2], index: 0, kind: input, shape index: {}]   ;;  %s89_s1 = inlined_call_operand.vmem [shape: f32[4,512], index: 1, kind: input, shape index: {}, may-alias: {1,2}]   ;;  %s90_s2 = inlined_call_operand.vmem [shape: f32[4,512], index: 2, kind: output, shape index: {}, may-alias: {1,2}]  }
   0x1   :  { %s14_s11 = sshll.u32 %s88_s0, 4  ;;  %s15_s11 = int_to_ptr.vmem [resolvable:$true] %s14_s11 }
   0x2   :  { %s43_s12 = scalar_lea.vmem %s15_s11, 16  ;;  %p48_p1 = scmp.lt.s32.totalorder %s15_s11, %s15_s11 }
   0x3   :  { %p44_p0 = scmp.ne.s32.totalorder %s15_s11, %s43_s12  ;;  %p49_p2 = scmp.lt.s32.totalorder %s43_s12, %s43_s12 }
   0x5   :  { %p50_p3 = por %p49_p2, %p48_p1 }
   0x7   :  { %p51_p4 = pnand %p50_p3, %p44_p0 }
   0x9   :  { %54 = shalt.err (!%p51_p4)
}
   0xa   :  { %s57_s13 = smov [#allocation2]  }
   0xb   :  { %17 = dma.vmem_to_smem %s15_s11, 16, %s57_s13, [#allocation3]  }
   0xc   :  { %55 = dma.done.wait [#allocation3], 16  }
   0xd   :  { %56 = vsyncadd [#allocation3], 4294967280 }
   0xe   :  { %23 = sfence }
   0xf   :  { %s24_s14 = sld [smem:[#allocation2]]  ;;  %v26_v0 = vld [vmem:[%s89_s1] sm:$0xff]  ;;  %v27_v1 = vld [vmem:[%s89_s1 + $0x8] sm:$0xff] }
  0x10   :  { %s41_s15 = sld [smem:[#allocation2 + $0x1]] }
  0x15   :  { %v28_v2 = vstv %s24_s14 }
  0x16   :  { %v29_v3 = vmul.f32 %v28_v2, %v26_v0  ;;  %v31_v4 = vstv %s41_s15  ;;  %v30_v5 = vmul.f32 %v28_v2, %v27_v1 }
  0x18   :  { %v32_v6 = vadd.f32 %v31_v4, %v29_v3  ;;  %v33_v7 = vadd.f32 %v31_v4, %v30_v5 }
  0x1a   :  { %34 = vst [vmem:[%s90_s2] sm:$0xff] %v32_v6  ;;  %35 = vst [vmem:[%s90_s2 + $0x8] sm:$0xff] %v33_v7 }
  0x1b   :  { %40 = vsyncpa [#allocation3], 1 }

</bundles_post_ra>
